<compile_context>
chip_gen: v6e
topology: v6e:2x2x1
jax: 0.10.0
libtpu: 0.0.40
codegen_flags: <defaults>
</compile_context>

<pallas_src>
import functools

import jax
import jax.numpy as jnp
from jax.experimental import pallas as pl
from jax.experimental.pallas import tpu as pltpu


def _round_up(x: int, m: int) -> int:
    return (x + m - 1) // m * m


def _cdiv(a: int, b: int) -> int:
    return (a + b - 1) // b


def _pick_tile_n(k: int, n: int, bytes_budget: int = 16 * 1024 * 1024) -> int:
    """Widest lane-aligned output-tile width TN such that a double-buffered
    bf16 [K, TN] weight tile fits `bytes_budget` (v7x 64 MiB/TC safe), capped
    at the 128-rounded logical output width so tiny layers use one tile."""
    n128 = _round_up(max(n, 1), 128)
    for cand in (2048, 1024, 512, 256, 128):
        if 2 * k * cand * 2 <= bytes_budget:      # 2 buffers * K*TN * 2B (bf16)
            return min(cand, n128)
    return 128


def _linear_tile_kernel(x_ref, w_ref, b_ref, o_ref, *, activation):
    """One lane-aligned output tile of  act(x @ W + b).

    x_ref : [Bp, K]      f32   resident across the grid (constant block index)
    w_ref : [1, K, TN]   bf16  streamed, tile-major => one contiguous HBM DMA
    b_ref : [1, TN]      f32   streamed
    o_ref : [Bp, TN]     f32   output tile (lane-dense stores)
    """
    x = x_ref[...].astype(w_ref.dtype)            # tiny cast, MXU-native bf16
    y = jnp.dot(x, w_ref[0], preferred_element_type=jnp.float32)
    y = y + b_ref[...]
    if activation == "tanh":
        y = jnp.tanh(y)
    elif activation == "relu":
        y = jnp.maximum(y, 0.0)
    o_ref[...] = y


def streaming_linear(x, w_tiles, b, activation=None):
    """act(x @ W + b) where W is pre-laid-out tile-major [NT, K, TN] bf16.

    x: [Bp, K] f32, b: [1, NT*TN] f32.  Returns [Bp, NT*TN] f32.
    The single grid axis walks the NT weight tiles ("parallel": independent
    output tiles -> v7x megacore sharding); x stays VMEM-resident.
    """
    bp, k = x.shape
    nt, kw, tn = w_tiles.shape
    assert kw == k, (kw, k)
    n_pad = nt * tn

    kernel = functools.partial(_linear_tile_kernel, activation=activation)
    return pl.pallas_call(
        kernel,
        out_shape=jax.ShapeDtypeStruct((bp, n_pad), jnp.float32),
        grid_spec=pltpu.PrefetchScalarGridSpec(
            num_scalar_prefetch=0,
            grid=(nt,),
            in_specs=[
                pl.BlockSpec((bp, k), lambda j: (0, 0)),        # resident acts
                pl.BlockSpec((1, k, tn), lambda j: (j, 0, 0)),  # contiguous W tile
                pl.BlockSpec((1, tn), lambda j: (0, j)),        # bias tile
            ],
            out_specs=pl.BlockSpec((bp, tn), lambda j: (0, j)),
        ),
        compiler_params=pltpu.CompilerParams(
            dimension_semantics=("parallel",),   # independent output tiles
            vmem_limit_bytes=48 * 1024 * 1024,   # safe under v7x's 64 MiB/TC
        ),
    )(x, w_tiles, b)


def _tile_major(w_full, nt, tn):
    """[K, NT*TN] -> [NT, K, TN] bf16 so each streamed tile is contiguous."""
    k = w_full.shape[0]
    return (w_full.reshape(k, nt, tn).transpose(1, 0, 2).astype(jnp.bfloat16))


class MapperEncoderPallas:
    """JAX/Pallas re-implementation of MapperEncoder.forward (mode None / 'v')."""

    def __init__(self, hidden_size: int, prompt_len: int, key):
        self.hidden_size = hidden_size
        self.prompt_len = prompt_len
        h1 = hidden_size * prompt_len // 2
        h2 = hidden_size * prompt_len
        self.h1, self.h2 = h1, h2

        k1, k2 = jax.random.split(key)
        sigma = 0.1  # MLP.initialization('normal', sigma=0.1); biases zeroed.
        w1 = sigma * jax.random.normal(k1, (hidden_size, h1), jnp.float32)
        w2 = sigma * jax.random.normal(k2, (h1, h2), jnp.float32)

        # ---- layer 1:  H -> H1  (padded up to nt1*tn1 lanes) ----
        tn1 = _pick_tile_n(hidden_size, h1)
        nt1 = _cdiv(h1, tn1)
        h1p = nt1 * tn1
        w1f = jnp.zeros((hidden_size, h1p), jnp.float32).at[:, :h1].set(w1)
        self.w1_t = _tile_major(w1f, nt1, tn1)            # [nt1, H, tn1] bf16
        self.b1 = jnp.zeros((1, h1p), jnp.float32)
        self.h1_pad = h1p

        # ---- layer 2:  H1p -> H2  (padded up to nt2*tn2 lanes) ----
        tn2 = _pick_tile_n(h1p, h2)
        nt2 = _cdiv(h2, tn2)
        h2p = nt2 * tn2
        w2f = jnp.zeros((h1p, h2p), jnp.float32).at[:h1, :h2].set(w2)
        self.w2_t = _tile_major(w2f, nt2, tn2)            # [nt2, H1p, tn2] bf16
        self.b2 = jnp.zeros((1, h2p), jnp.float32)
        self.h2_pad = h2p

    def __call__(self, batched_inputs, mode=None):
        # TODO(synk): pre_encoder (GTransformerEncoder) is not defined in the
        # reference module; it is treated as an identity pass-through that
        # already produced ATT_FEATS in batched_inputs.
        ret = dict(batched_inputs)
        if mode is None or mode == 'v':
            att_feats = ret['ATT_FEATS']                  # [B, S, H]
            gfeat = att_feats[:, 0]                       # [B, H]
            batch_size = gfeat.shape[0]

            # Pad to a full packed bf16 sublane group (16 rows).
            bp = _round_up(max(batch_size, 1), 16)
            x = jnp.zeros((bp, self.hidden_size), jnp.float32)
            x = x.at[:batch_size].set(gfeat.astype(jnp.float32))

            h = streaming_linear(x, self.w1_t, self.b1, activation="tanh")
            y = streaming_linear(h, self.w2_t, self.b2, activation=None)

            flat = y[:batch_size, :self.h2]               # drop all padding
            v_prompt = flat.reshape(batch_size, self.prompt_len, -1)  # [B,P,H]
            ret['ATT_FEATS'] = v_prompt

            vmasks = jnp.ones((batch_size, self.prompt_len), v_prompt.dtype)
            vmasks = vmasks[:, None, None, :]             # unsqueeze(1).unsqueeze(2)
            ret['ATT_MASKS'] = vmasks
            ret['EXT_ATT_MASKS'] = (1.0 - vmasks) * -10000.0
        return ret


if __name__ == "__main__":
    key = jax.random.PRNGKey(0)
    k_feat, k_params = jax.random.split(key)

    B, S, H, P = 2, 8, 32, 10    # batch, seq, hidden, prompt_len
    att_feats = jax.random.normal(k_feat, (B, S, H), jnp.float32)

    enc = MapperEncoderPallas(hidden_size=H, prompt_len=P, key=k_params)
    ret = enc({'ATT_FEATS': att_feats}, mode=None)

    v_prompt = jax.block_until_ready(ret['ATT_FEATS'])
    vmasks = jax.block_until_ready(ret['ATT_MASKS'])
    ext_vmasks = jax.block_until_ready(ret['EXT_ATT_MASKS'])

    # Plain-JAX reference using the same (bf16-rounded) weights, biases = 0.
    w1_full = (jnp.transpose(enc.w1_t, (1, 0, 2))
               .reshape(H, enc.h1_pad).astype(jnp.float32)[:, :enc.h1])
    w2_full = (jnp.transpose(enc.w2_t, (1, 0, 2))
               .reshape(enc.h1_pad, enc.h2_pad)
               .astype(jnp.float32)[:enc.h1, :enc.h2])
    gfeat_r = att_feats[:, 0].astype(jnp.bfloat16).astype(jnp.float32)
    h_ref = jnp.tanh(gfeat_r @ w1_full)
    ref = (h_ref @ w2_full).reshape(B, P, H)

    assert v_prompt.shape == (B, P, H), v_prompt.shape
    assert vmasks.shape == (B, 1, 1, P), vmasks.shape
    assert ext_vmasks.shape == (B, 1, 1, P), ext_vmasks.shape
    max_err = float(jnp.max(jnp.abs(v_prompt - ref)))
    assert jnp.allclose(v_prompt, ref, atol=2e-2, rtol=2e-2), max_err
    assert bool(jnp.all(vmasks == 1.0)) and bool(jnp.all(ext_vmasks == 0.0))

    print("KERNEL_OK")
</pallas_src>

<mosaic_0001>
module attributes {stable_mosaic.version = 11 : i64} {
  func.func @_linear_tile_kernel(%arg0: i32, %arg1: memref<16x32xf32, #tpu.memory_space<vmem>>, %arg2: memref<1x32x256xbf16, #tpu.memory_space<vmem>>, %arg3: memref<1x256xf32, #tpu.memory_space<vmem>>, %arg4: memref<16x256xf32, #tpu.memory_space<vmem>>) attributes {dimension_semantics = [#tpu.dimension_semantics<parallel>], iteration_bounds = array<i64: 1>, scalar_prefetch = 0 : i64, scratch_operands = 0 : i64, tpu.core_type = #tpu.core_type<tc>, window_params = [{pipeline_mode = #tpu.pipeline_mode<synchronous>, transform_indices = @transform_0, window_bounds = array<i64: 16, 32>}, {transform_indices = @transform_1, window_bounds = array<i64: 1, 32, 256>}, {transform_indices = @transform_2, window_bounds = array<i64: 1, 256>}, {transform_indices = @transform_3, window_bounds = array<i64: 16, 256>}]} {
    %c0 = arith.constant 0 : index
    %c0_0 = arith.constant 0 : index
    %0 = vector.load %arg1[%c0, %c0_0] : memref<16x32xf32, #tpu.memory_space<vmem>>, vector<16x32xf32>
    %1 = arith.truncf %0 : vector<16x32xf32> to vector<16x32xbf16>
    %c0_1 = arith.constant 0 : index
    %c0_2 = arith.constant 0 : index
    %c0_3 = arith.constant 0 : index
    %2 = vector.load %arg2[%c0_1, %c0_2, %c0_3] : memref<1x32x256xbf16, #tpu.memory_space<vmem>>, vector<1x32x256xbf16>
    %3 = vector.shape_cast %2 : vector<1x32x256xbf16> to vector<32x256xbf16>
    %cst = arith.constant dense<0.000000e+00> : vector<16x256xf32>
    %4 = tpu.matmul %1, %3, %cst {dimension_numbers = #tpu.dot_dimension_numbers<[1], [0], [0], [1], [0, 0, 1, 1], [], []>} : vector<16x32xbf16>, vector<32x256xbf16>, vector<16x256xf32> -> vector<16x256xf32>
    %c0_4 = arith.constant 0 : index
    %c0_5 = arith.constant 0 : index
    %5 = vector.load %arg3[%c0_4, %c0_5] : memref<1x256xf32, #tpu.memory_space<vmem>>, vector<1x256xf32>
    %6 = vector.broadcast %5 : vector<1x256xf32> to vector<16x256xf32>
    %7 = arith.addf %4, %6 : vector<16x256xf32>
    %8 = math.tanh %7 : vector<16x256xf32>
    %c0_6 = arith.constant 0 : index
    %c0_7 = arith.constant 0 : index
    %9 = vector.load %arg4[%c0_6, %c0_7] : memref<16x256xf32, #tpu.memory_space<vmem>>, vector<16x256xf32>
    tpu.vector_store %arg4[%c0_6, %c0_7], %8 {strides = array<i32>} : memref<16x256xf32, #tpu.memory_space<vmem>>, vector<16x256xf32>,
    return
  }
  func.func @transform_0(%arg0: i32) -> (i32, i32) {
    %c0_i32 = arith.constant 0 : i32
    %c0_i32_0 = arith.constant 0 : i32
    %c0_i32_1 = arith.constant 0 : i32
    return %c0_i32, %c0_i32_0 : i32, i32
  }
  func.func @transform_1(%arg0: i32) -> (i32, i32, i32) {
    %c0_i32 = arith.constant 0 : i32
    %c0_i32_0 = arith.constant 0 : i32
    %c0_i32_1 = arith.constant 0 : i32
    return %arg0, %c0_i32, %c0_i32_0 : i32, i32, i32
  }
  func.func @transform_2(%arg0: i32) -> (i32, i32) {
    %c0_i32 = arith.constant 0 : i32
    %c0_i32_0 = arith.constant 0 : i32
    return %c0_i32, %arg0 : i32, i32
  }
  func.func @transform_3(%arg0: i32) -> (i32, i32) {
    %c0_i32 = arith.constant 0 : i32
    %c0_i32_0 = arith.constant 0 : i32
    return %c0_i32, %arg0 : i32, i32
  }
}

</mosaic_0001>

<bundles_post_ra>
// kernel: tpu_custom_call.1
= control target key start
LH: loop header
LB: loop body
LE: loop exit
PB: predicated region body
PF: predicated region fallthrough
CT: control target
= control target key end

     0   :  { %8 = vsyncpa [#allocation3], 0  ;;  %s289_s0 = inlined_call_operand.hbm [shape: f32[16,32], index: 0, kind: input, shape index: {}]   ;;  %s290_s1 = inlined_call_operand.hbm [shape: bf16[1,32,256], index: 1, kind: input, shape index: {}]   ;;  %s291_s2 = inlined_call_operand.vmem [shape: f32[1,256], index: 2, kind: input, shape index: {}]   ;;  %s292_s3 = inlined_call_operand.hbm [shape: f32[16,256], index: 3, kind: output, shape index: {}]  }
   0x1   :  { %9 = vsyncpa [#allocation6], 0 }
   0x2   :  { %10 = vsyncpa [#allocation4], 0  ;;  %s249_s12 = smov [#allocation2]  }
   0x3   :  { %s16_s13 = sshll.u32 %s249_s12, 4  ;;  %s17_s13 = int_to_ptr.vmem [resolvable:$true] %s16_s13 }
   0x4   :  { %s191_s14 = scalar_lea.vmem %s17_s13, 256  ;;  %p196_p1 = scmp.lt.s32.totalorder %s17_s13, %s17_s13 }
   0x5   :  { %p192_p0 = scmp.ne.s32.totalorder %s17_s13, %s191_s14  ;;  %p197_p2 = scmp.lt.s32.totalorder %s191_s14, %s191_s14 }
   0x7   :  { %p198_p3 = por %p197_p2, %p196_p1 }
   0x9   :  { %p199_p4 = pnand %p198_p3, %p192_p0 }
   0xb   :  { %202 = shalt.err (!%p199_p4)
}
   0xc   :  { %s250_s15 = smov 128   ;;  %s251_s16 = smov 8  }
   0xd   :  { %22 = dma.hbm_to_vmem [thread:$0]  %s289_s0, 256, %s17_s13, [#allocation3], %s250_s15, %s250_s15, %s251_s16  }
   0xe   :  { %s252_s19 = smov [#allocation5]  }
   0xf   :  { %s28_s20 = sshll.u32 %s252_s19, 4  ;;  %s29_s20 = int_to_ptr.vmem [resolvable:$true] %s28_s20 }
  0x10   :  { %s211_s21 = scalar_lea.vmem %s29_s20, 512  ;;  %p216_p6 = scmp.lt.s32.totalorder %s29_s20, %s29_s20 }
  0x11   :  { %p212_p5 = scmp.ne.s32.totalorder %s29_s20, %s211_s21  ;;  %p217_p7 = scmp.lt.s32.totalorder %s211_s21, %s211_s21 }
  0x13   :  { %p218_p8 = por %p217_p7, %p216_p6 }
  0x15   :  { %p219_p9 = pnand %p218_p8, %p212_p5 }
  0x17   :  { %222 = shalt.err (!%p219_p9)
}
  0x18   :  { %34 = dma.hbm_to_vmem [thread:$0]  %s290_s1, 512, %s29_s20, [#allocation6], %s250_s15, %s250_s15, %s251_s16  }
  0x19   :  { %243 = dma.done.wait [#allocation3], 256  }
  0x1a   :  { %244 = vsyncadd [#allocation3], 4294967040 }
  0x1b   :  { %245 = dma.done.wait [#allocation6], 512  }
  0x1c   :  { %246 = vsyncadd [#allocation6], 4294966784  ;;  %v253_v0 = vmov 0   ;;  %v169_v1 = vld [vmem:[#allocation5 + $0x14] ss:$8 sps:$4 sm:$0xff]   ;;  %vm83_vm0 = vcmask 261120   ;;  %v53_v8 = vlaneseq }
  0x1d   :  { %119 = vmatprep.mubr.bf16.mxu0 %v253_v0  ;;  %v171_v2 = vld [vmem:[#allocation5 + $0x10] ss:$8 sps:$4 sm:$0xff]   ;;  %99 = vmatprep.subr.bf16.mxu0 %v169_v1  ;;  %v172_v3 = vld [vmem:[#allocation5 + $0x4] ss:$8 sps:$4 sm:$0xff]   ;;  %v174_v4 = vld [vmem:[#allocation5] ss:$8 sps:$4 sm:$0xff]  }
  0x1e   :  { %100 = vmatpush1.bf16.msra.mxu0 %v171_v2  ;;  %v44_v5 = vld [vmem:[#allocation2] sm:$0xff]  ;;  %v45_v6 = vld [vmem:[#allocation2 + $0x8] sm:$0xff]  ;;  %v54_v9 = vshrl.u32 %v53_v8, 7  ;;  %s254_s24 = smov [#allocation7]  }
  0x1f   :  { %101 = vmatprep.subr.bf16.mxu0 %v172_v3  ;;  %v46_v7 = vpack.c.bf16 %v45_v6, %v44_v5  ;;  %v51_v11 = vld [vmem:[%s291_s2] sm:$0x3]  ;;  %s143_s25 = sshll.u32 %s254_s24, 4  ;;  %s144_s25 = int_to_ptr.vmem [resolvable:$true] %s143_s25 }
  0x20   :  { %v55_v10 = vsub.s32 0, %v54_v9  ;;  %v59_v12 = vsub.s32 1, %v54_v9  ;;  %s223_s2 = scalar_lea.vmem %s144_s25, 512  ;;  %p228_p11 = scmp.lt.s32.totalorder %s144_s25, %s144_s25 }
  0x21   :  { %p224_p10 = scmp.ne.s32.totalorder %s144_s25, %s223_s2  ;;  %p229_p12 = scmp.lt.s32.totalorder %s223_s2, %s223_s2 }
  0x22   :  { %102 = vmatpush1.bf16.msra.mxu0 %v174_v4  ;;  %v56_v13 = vrot.slane %v51_v11, %v55_v10  ;;  %v60_v14 = vrot.slane %v51_v11, %v59_v12 }
  0x23   :  { %p230_p13 = por %p229_p12, %p228_p11 }
  0x25   :  { %160 = vmatmul.mubr.msk.bf16.vlgmr.msra.gmra.mxu0 %vm83_vm0, %v46_v7  ;;  %p231_p0 = pnand %p230_p13, %p224_p10 }
  0xe5   :  { %v121_v15 = vpop.f32.mrf.mxu0 }
  0xe6   :  { %v122_v16 = vadd.f32 %v121_v15, %v56_v13 }
  0xe7   :  { %v123_v17 = vpop.f32.mrf.mxu0 }
  0xe8   :  { %175 = vtanh.f32 %v122_v16  ;;  %v124_v18 = vadd.f32 %v123_v17, %v60_v14 }
  0xe9   :  { %v125_v19 = vpop.f32.mrf.mxu0 }
  0xea   :  { %177 = vtanh.f32 %v124_v18  ;;  %v126_v20 = vadd.f32 %v125_v19, %v56_v13 }
  0xeb   :  { %v127_v21 = vpop.f32.mrf.mxu0 }
  0xec   :  { %179 = vtanh.f32 %v126_v20  ;;  %v128_v22 = vadd.f32 %v127_v21, %v60_v14 }
  0xee   :  { %181 = vtanh.f32 %v128_v22 }
  0xf5   :  { %v176_v23 = vpop.eup %175 }
  0xf6   :  { %134 = vst [vmem:[#allocation7] sm:$0xff] %v176_v23 }
  0xf7   :  { %v178_v24 = vpop.eup %177 }
  0xf8   :  { %135 = vst [vmem:[#allocation7 + $0x8] sm:$0xff] %v178_v24 }
  0xf9   :  { %v180_v25 = vpop.eup %179 }
  0xfa   :  { %136 = vst [vmem:[#allocation7 + $0x10] sm:$0xff] %v180_v25 }
  0xfb   :  { %v182_v26 = vpop.eup %181 }
  0xfc   :  { %137 = vst [vmem:[#allocation7 + $0x18] sm:$0xff] %v182_v26 }
  0xfd   :  { %234 = shalt.err (!%p231_p0)
}
  0xfe   :  { %s255_s26 = smov 256   ;;  %s256_s27 = smov 16  }
  0xff   :  { %149 = dma.vmem_to_hbm [thread:$0]  %s144_s25, 512, %s292_s3, [#allocation4], %s255_s26, %s255_s26, %s256_s27  }
 0x100   :  { %247 = dma.done.wait [#allocation4], 512  }
 0x101   :  { %248 = vsyncadd [#allocation4], 4294966784 }
 0x102   :  { %153 = vsyncpa [#allocation3], 1 }
 0x103   :  { %154 = vsyncpa [#allocation6], 1 }
 0x104   :  { %155 = vsyncpa [#allocation4], 1 }

</bundles_post_ra>
